<compile_context>
chip_gen: v6e
topology: v6e:2x2x1
jax: 0.10.0
libtpu: 0.0.40
codegen_flags: <defaults>
</compile_context>

<pallas_src>
import functools

import jax
import jax.numpy as jnp
from jax.experimental import pallas as pl
from jax.experimental.pallas import tpu as pltpu

EPS = 1e-3  # BatchNorm2d(eps=0.001)


def bn_relu_kernel(x_ref, gamma_ref, beta_ref, o_ref, *, inv_count):
    # x_ref: (N, C_blk, HW) f32 ; gamma/beta: (1, C_blk, 1) f32
    x = x_ref[...]
    s = jnp.sum(x, axis=(0, 2), keepdims=True)        # (1, Cb, 1)
    sq = jnp.sum(x * x, axis=(0, 2), keepdims=True)   # (1, Cb, 1)
    mean = s * inv_count
    var = sq * inv_count - mean * mean                # biased (training) var
    var = jnp.maximum(var, 0.0)                       # guard cancellation
    inv_std = jax.lax.rsqrt(var + EPS)                # EUP
    scale = gamma_ref[...] * inv_std                  # (1, Cb, 1)
    shift = beta_ref[...] - mean * scale              # (1, Cb, 1)
    y = x * scale + shift
    o_ref[...] = jnp.maximum(y, 0.0).astype(o_ref.dtype)


def _num_channel_blocks(C):
    """2-way channel split only where a second TensorCore exists (v7x)."""
    two_tc = False
    try:
        kind = jax.devices()[0].device_kind.lower()
        two_tc = ("v7" in kind) or ("7x" in kind)
    except Exception:
        two_tc = False
    if two_tc and C % 2 == 0 and (C // 2) % 8 == 0:
        return 2
    return 1


def batchnorm_relu(x_nchw, gamma, beta):
    """Training-mode BatchNorm2d(eps=1e-3) + ReLU. x_nchw: (N,C,H,W) f32."""
    N, C, H, W = x_nchw.shape
    HW = H * W
    count = N * HW

    # Pure reshape (bitcast), NCHW layout preserved; no transpose for any N.
    x_3d = x_nchw.reshape(N, C, HW)
    gamma_3d = gamma.reshape(1, C, 1).astype(jnp.float32)
    beta_3d = beta.reshape(1, C, 1).astype(jnp.float32)

    nb = _num_channel_blocks(C)
    c_block = C // nb
    grid = (nb,)

    # TODO(synk): if M = N*H*W grows large (v7x 64 MiB VMEM), switch to an
    # M-tiled "arbitrary" accumulation grid (sum/sumsq scratch + second
    # normalize pass) instead of a resident full-M block.

    kernel = functools.partial(bn_relu_kernel, inv_count=1.0 / count)

    out_3d = pl.pallas_call(
        kernel,
        out_shape=jax.ShapeDtypeStruct((N, C, HW), x_nchw.dtype),
        grid=grid,
        in_specs=[
            pl.BlockSpec((N, c_block, HW), lambda i: (0, i, 0)),
            pl.BlockSpec((1, c_block, 1), lambda i: (0, i, 0)),
            pl.BlockSpec((1, c_block, 1), lambda i: (0, i, 0)),
        ],
        out_specs=pl.BlockSpec((N, c_block, HW), lambda i: (0, i, 0)),
        compiler_params=pltpu.CompilerParams(
            dimension_semantics=("parallel",)),
    )(x_3d, gamma_3d, beta_3d)

    return out_3d.reshape(N, C, H, W)


def reference(x_nchw, gamma, beta):
    # Pure-JAX reference (training-mode batchnorm + relu).
    mean = jnp.mean(x_nchw, axis=(0, 2, 3), keepdims=True)
    var = jnp.mean((x_nchw - mean) ** 2, axis=(0, 2, 3), keepdims=True)
    y = (x_nchw - mean) / jnp.sqrt(var + EPS)
    y = y * gamma.reshape(1, -1, 1, 1) + beta.reshape(1, -1, 1, 1)
    return jnp.maximum(y, 0.0)


if __name__ == "__main__":
    key = jax.random.PRNGKey(0)
    kx, kg, kb = jax.random.split(key, 3)

    N, C, H, W = 1, 192, 12, 12   # shape implied by the module (x178)
    x = jax.random.normal(kx, (N, C, H, W), dtype=jnp.float32)
    # Deterministic non-trivial affine parameters for BatchNorm2d(192).
    gamma = 1.0 + 0.1 * jax.random.normal(kg, (C,), dtype=jnp.float32)
    beta = 0.1 * jax.random.normal(kb, (C,), dtype=jnp.float32)

    out = batchnorm_relu(x, gamma, beta)
    out = jax.block_until_ready(out)

    ref = reference(x, gamma, beta)
    assert out.shape == (N, C, H, W)
    assert jnp.allclose(out, ref, atol=1e-4, rtol=1e-4), "mismatch vs reference"

    # TODO(synk): running_mean/running_var momentum update (training-mode side
    # effect) is not produced; the forward output does not depend on it.
    print("KERNEL_OK")
</pallas_src>

<mosaic_0001>
module attributes {stable_mosaic.version = 11 : i64} {
  func.func @bn_relu_kernel(%arg0: i32, %arg1: memref<1x192x144xf32, #tpu.memory_space<vmem>>, %arg2: memref<1x192x1xf32, #tpu.memory_space<vmem>>, %arg3: memref<1x192x1xf32, #tpu.memory_space<vmem>>, %arg4: memref<1x192x144xf32, #tpu.memory_space<vmem>>) attributes {dimension_semantics = [#tpu.dimension_semantics<parallel>], iteration_bounds = array<i64: 1>, scalar_prefetch = 0 : i64, scratch_operands = 0 : i64, tpu.core_type = #tpu.core_type<tc>, window_params = [{transform_indices = @transform_0, window_bounds = array<i64: 1, 192, 144>}, {transform_indices = @transform_1, window_bounds = array<i64: 1, 192, 1>}, {transform_indices = @transform_2, window_bounds = array<i64: 1, 192, 1>}, {transform_indices = @transform_3, window_bounds = array<i64: 1, 192, 144>}]} {
    %c0 = arith.constant 0 : index
    %c0_0 = arith.constant 0 : index
    %c0_1 = arith.constant 0 : index
    %0 = vector.load %arg1[%c0, %c0_0, %c0_1] : memref<1x192x144xf32, #tpu.memory_space<vmem>>, vector<1x192x144xf32>
    %cst = arith.constant dense<0.000000e+00> : vector<192xf32>
    %1 = vector.multi_reduction <add>, %0, %cst [0, 2] : vector<1x192x144xf32> to vector<192xf32>
    %2 = vector.shape_cast %1 : vector<192xf32> to vector<1x192x1xf32>
    %3 = arith.mulf %0, %0 : vector<1x192x144xf32>
    %cst_2 = arith.constant dense<0.000000e+00> : vector<192xf32>
    %4 = vector.multi_reduction <add>, %3, %cst_2 [0, 2] : vector<1x192x144xf32> to vector<192xf32>
    %5 = vector.shape_cast %4 : vector<192xf32> to vector<1x192x1xf32>
    %cst_3 = arith.constant 0.0069444445 : f32
    %6 = vector.broadcast %cst_3 : f32 to vector<1x192x1xf32>
    %7 = arith.mulf %2, %6 : vector<1x192x1xf32>
    %cst_4 = arith.constant 0.0069444445 : f32
    %8 = vector.broadcast %cst_4 : f32 to vector<1x192x1xf32>
    %9 = arith.mulf %5, %8 : vector<1x192x1xf32>
    %10 = arith.mulf %7, %7 : vector<1x192x1xf32>
    %11 = arith.subf %9, %10 : vector<1x192x1xf32>
    %cst_5 = arith.constant 0.000000e+00 : f32
    %12 = vector.broadcast %cst_5 : f32 to vector<1x192x1xf32>
    %13 = arith.maximumf %11, %12 : vector<1x192x1xf32>
    %cst_6 = arith.constant 1.000000e-03 : f32
    %14 = vector.broadcast %cst_6 : f32 to vector<1x192x1xf32>
    %15 = arith.addf %13, %14 : vector<1x192x1xf32>
    %16 = math.rsqrt %15 : vector<1x192x1xf32>
    %c0_7 = arith.constant 0 : index
    %c0_8 = arith.constant 0 : index
    %c0_9 = arith.constant 0 : index
    %17 = vector.load %arg2[%c0_7, %c0_8, %c0_9] : memref<1x192x1xf32, #tpu.memory_space<vmem>>, vector<1x192x1xf32>
    %18 = arith.mulf %17, %16 : vector<1x192x1xf32>
    %c0_10 = arith.constant 0 : index
    %c0_11 = arith.constant 0 : index
    %c0_12 = arith.constant 0 : index
    %19 = vector.load %arg3[%c0_10, %c0_11, %c0_12] : memref<1x192x1xf32, #tpu.memory_space<vmem>>, vector<1x192x1xf32>
    %20 = arith.mulf %7, %18 : vector<1x192x1xf32>
    %21 = arith.subf %19, %20 : vector<1x192x1xf32>
    %22 = vector.broadcast %18 : vector<1x192x1xf32> to vector<1x192x144xf32>
    %23 = arith.mulf %0, %22 : vector<1x192x144xf32>
    %24 = vector.broadcast %21 : vector<1x192x1xf32> to vector<1x192x144xf32>
    %25 = arith.addf %23, %24 : vector<1x192x144xf32>
    %cst_13 = arith.constant 0.000000e+00 : f32
    %26 = vector.broadcast %cst_13 : f32 to vector<1x192x144xf32>
    %27 = arith.maximumf %25, %26 : vector<1x192x144xf32>
    %c0_14 = arith.constant 0 : index
    %c0_15 = arith.constant 0 : index
    %c0_16 = arith.constant 0 : index
    %28 = vector.load %arg4[%c0_14, %c0_15, %c0_16] : memref<1x192x144xf32, #tpu.memory_space<vmem>>, vector<1x192x144xf32>
    tpu.vector_store %arg4[%c0_14, %c0_15, %c0_16], %27 {strides = array<i32>} : memref<1x192x144xf32, #tpu.memory_space<vmem>>, vector<1x192x144xf32>,
    return
  }
  func.func @transform_0(%arg0: i32) -> (i32, i32, i32) {
    %c0_i32 = arith.constant 0 : i32
    %c0_i32_0 = arith.constant 0 : i32
    %c0_i32_1 = arith.constant 0 : i32
    return %c0_i32, %arg0, %c0_i32_0 : i32, i32, i32
  }
  func.func @transform_1(%arg0: i32) -> (i32, i32, i32) {
    %c0_i32 = arith.constant 0 : i32
    %c0_i32_0 = arith.constant 0 : i32
    %c0_i32_1 = arith.constant 0 : i32
    return %c0_i32, %arg0, %c0_i32_0 : i32, i32, i32
  }
  func.func @transform_2(%arg0: i32) -> (i32, i32, i32) {
    %c0_i32 = arith.constant 0 : i32
    %c0_i32_0 = arith.constant 0 : i32
    %c0_i32_1 = arith.constant 0 : i32
    return %c0_i32, %arg0, %c0_i32_0 : i32, i32, i32
  }
  func.func @transform_3(%arg0: i32) -> (i32, i32, i32) {
    %c0_i32 = arith.constant 0 : i32
    %c0_i32_0 = arith.constant 0 : i32
    %c0_i32_1 = arith.constant 0 : i32
    return %c0_i32, %arg0, %c0_i32_0 : i32, i32, i32
  }
}

</mosaic_0001>

<bundles_post_ra>
// kernel: tpu_custom_call.1
= control target key start
LH: loop header
LB: loop body
LE: loop exit
PB: predicated region body
PF: predicated region fallthrough
CT: control target
= control target key end

     0   :  { %vm62_vm0 = vcmask 130048   ;;  %s2372_s0 = inlined_call_operand.vmem [shape: f32[1,192,144], index: 0, kind: input, shape index: {}]   ;;  %s2373_s1 = inlined_call_operand.vmem [shape: f32[1,192,1], index: 1, kind: input, shape index: {}]   ;;  %s2374_s2 = inlined_call_operand.vmem [shape: f32[1,192,1], index: 2, kind: input, shape index: {}]   ;;  %s2375_s3 = inlined_call_operand.vmem [shape: f32[1,192,144], index: 3, kind: output, shape index: {}]  }
   0x1   :  { %v1150_v0 = vld [vmem:[%s2372_s0 + $0x20] sm:$0xff]  ;;  %v1155_v1 = vld [vmem:[%s2372_s0 + $0x28] sm:$0xff]  ;;  %v1172_v5 = vld [vmem:[%s2372_s0 + $0x30] sm:$0xff] }
   0x2   :  { %v1160_v2 = vld [vmem:[%s2372_s0] sm:$0xff]  ;;  %v71_v3 = vsel %vm62_vm0, %v1155_v1, 0.0  ;;  %v1167_v4 = vld [vmem:[%s2372_s0 + $0x8] sm:$0xff]  ;;  %v1177_v6 = vld [vmem:[%s2372_s0 + $0x38] sm:$0xff] }
   0x3   :  { %v72_v7 = vadd.f32 %v71_v3, %v1150_v0  ;;  %v63_v8 = vsel %vm62_vm0, %v1167_v4, 0.0  ;;  %v75_v9 = vsel %vm62_vm0, %v1177_v6, 0.0  ;;  %v1187_v10 = vld [vmem:[%s2372_s0 + $0x10] sm:$0xff]  ;;  %v1192_v11 = vld [vmem:[%s2372_s0 + $0x18] sm:$0xff]  ;;  %v1205_v15 = vld [vmem:[%s2372_s0 + $0x48] sm:$0xff] }
   0x4   :  { %v64_v12 = vadd.f32 %v63_v8, %v1160_v2  ;;  %v67_v13 = vsel %vm62_vm0, %v1192_v11, 0.0  ;;  %v1200_v14 = vld [vmem:[%s2372_s0 + $0x58] sm:$0xff]  ;;  %v76_v16 = vadd.f32 %v75_v9, %v1172_v5  ;;  %v1212_v18 = vld [vmem:[%s2372_s0 + $0x50] sm:$0xff]  ;;  %v1219_v20 = vld [vmem:[%s2372_s0 + $0x40] sm:$0xff]  ;;  %v79_v21 = vsel %vm62_vm0, %v1205_v15, 0.0 }
   0x5   :  { %73 = vadd.xlane.f32.xlu1 %v72_v7  ;;  %v68_v17 = vadd.f32 %v67_v13, %v1187_v10  ;;  %v83_v19 = vsel %vm62_vm0, %v1200_v14, 0.0  ;;  %v1226_v22 = vld [vmem:[%s2372_s0 + $0x78] sm:$0xff]  ;;  %v1231_v23 = vld [vmem:[%s2372_s0 + $0x68] sm:$0xff]  ;;  %v80_v25 = vadd.f32 %v79_v21, %v1219_v20  ;;  %v1238_v26 = vld [vmem:[%s2372_s0 + $0x70] sm:$0xff] }
   0x6   :  { %65 = vadd.xlane.f32.xlu0 %v64_v12  ;;  %v84_v24 = vadd.f32 %v83_v19, %v1212_v18  ;;  %v91_v27 = vsel %vm62_vm0, %v1226_v22, 0.0  ;;  %v1245_v28 = vld [vmem:[%s2372_s0 + $0x60] sm:$0xff]  ;;  %v87_v29 = vsel %vm62_vm0, %v1231_v23, 0.0  ;;  %v1252_v30 = vld [vmem:[%s2372_s0 + $0x98] sm:$0xff]  ;;  %v1257_v31 = vld [vmem:[%s2372_s0 + $0x88] sm:$0xff] }
   0x7   :  { %v92_v32 = vadd.f32 %v91_v27, %v1238_v26  ;;  %v88_v33 = vadd.f32 %v87_v29, %v1245_v28  ;;  %v1264_v34 = vld [vmem:[%s2372_s0 + $0x90] sm:$0xff]  ;;  %v99_v35 = vsel %vm62_vm0, %v1252_v30, 0.0  ;;  %v1271_v36 = vld [vmem:[%s2372_s0 + $0x80] sm:$0xff]  ;;  %v95_v37 = vsel %vm62_vm0, %v1257_v31, 0.0  ;;  %v1278_v38 = vld [vmem:[%s2372_s0 + $0xb8] sm:$0xff] }
   0x8   :  { %v1283_v39 = vld [vmem:[%s2372_s0 + $0xa8] sm:$0xff]  ;;  %v100_v40 = vadd.f32 %v99_v35, %v1264_v34  ;;  %v96_v41 = vadd.f32 %v95_v37, %v1271_v36  ;;  %v1290_v42 = vld [vmem:[%s2372_s0 + $0xb0] sm:$0xff]  ;;  %v107_v43 = vsel %vm62_vm0, %v1278_v38, 0.0  ;;  %v1297_v44 = vld [vmem:[%s2372_s0 + $0xa0] sm:$0xff] }
   0x9   :  { %77 = vadd.xlane.f32.xlu1 %v76_v16  ;;  %v103_v45 = vsel %vm62_vm0, %v1283_v39, 0.0  ;;  %v1304_v46 = vld [vmem:[%s2372_s0 + $0xd8] sm:$0xff]  ;;  %v1309_v47 = vld [vmem:[%s2372_s0 + $0xc8] sm:$0xff]  ;;  %v108_v48 = vadd.f32 %v107_v43, %v1290_v42  ;;  %v1316_v50 = vld [vmem:[%s2372_s0 + $0xd0] sm:$0xff] }
   0xa   :  { %69 = vadd.xlane.f32.xlu0 %v68_v17  ;;  %v104_v49 = vadd.f32 %v103_v45, %v1297_v44  ;;  %v115_v51 = vsel %vm62_vm0, %v1304_v46, 0.0  ;;  %v1323_v52 = vld [vmem:[%s2372_s0 + $0xc0] sm:$0xff]  ;;  %v111_v53 = vsel %vm62_vm0, %v1309_v47, 0.0  ;;  %v1330_v54 = vld [vmem:[%s2372_s0 + $0xf8] sm:$0xff]  ;;  %v1335_v55 = vld [vmem:[%s2372_s0 + $0xe8] sm:$0xff] }
   0xb   :  { %v116_v56 = vadd.f32 %v115_v51, %v1316_v50  ;;  %v112_v57 = vadd.f32 %v111_v53, %v1323_v52  ;;  %v1342_v58 = vld [vmem:[%s2372_s0 + $0xf0] sm:$0xff]  ;;  %v123_v59 = vsel %vm62_vm0, %v1330_v54, 0.0  ;;  %v1349_v60 = vld [vmem:[%s2372_s0 + $0xe0] sm:$0xff]  ;;  %v119_v61 = vsel %vm62_vm0, %v1335_v55, 0.0  ;;  %v1356_v62 = vld [vmem:[%s2372_s0 + $0x118] sm:$0xff] }
   0xc   :  { %v1361_v63 = vld [vmem:[%s2372_s0 + $0x108] sm:$0xff]  ;;  %v124_v3 = vadd.f32 %v123_v59, %v1342_v58  ;;  %v120_v7 = vadd.f32 %v119_v61, %v1349_v60  ;;  %v1368_v8 = vld [vmem:[%s2372_s0 + $0x110] sm:$0xff]  ;;  %v131_v9 = vsel %vm62_vm0, %v1356_v62, 0.0  ;;  %v1375_v12 = vld [vmem:[%s2372_s0 + $0x100] sm:$0xff]  ;;  %v162_v59 = vmul.f32 %v1192_v11, %v1192_v11 }
   0xd   :  { %85 = vadd.xlane.f32.xlu1 %v84_v24  ;;  %v127_v13 = vsel %vm62_vm0, %v1361_v63, 0.0  ;;  %v1382_v16 = vld [vmem:[%s2372_s0 + $0x138] sm:$0xff]  ;;  %v1387_v17 = vld [vmem:[%s2372_s0 + $0x128] sm:$0xff]  ;;  %v132_v19 = vadd.f32 %v131_v9, %v1368_v8  ;;  %v1394_v24 = vld [vmem:[%s2372_s0 + $0x130] sm:$0xff] }
   0xe   :  { %81 = vadd.xlane.f32.xlu0 %v80_v25  ;;  %v128_v21 = vadd.f32 %v127_v13, %v1375_v12  ;;  %v139_v25 = vsel %vm62_vm0, %v1382_v16, 0.0  ;;  %v1401_v27 = vld [vmem:[%s2372_s0 + $0x120] sm:$0xff]  ;;  %v135_v29 = vsel %vm62_vm0, %v1387_v17, 0.0  ;;  %v161_v13 = vmul.f32 %v1187_v10, %v1187_v10 }
   0xf   :  { %v140_v35 = vadd.f32 %v139_v25, %v1394_v24  ;;  %v136_v37 = vadd.f32 %v135_v29, %v1401_v27  ;;  %v1427_v43 = vld [vmem:[%s2372_s0 + $0x140] sm:$0xff]  ;;  %v166_v25 = vmul.f32 %v1177_v6, %v1177_v6  ;;  %v165_v10 = vmul.f32 %v1172_v5, %v1172_v5 }
  0x10   :  { %v1455_v61 = vld [vmem:[%s2372_s0 + $0x160] sm:$0xff]  ;;  %v170_v6 = vmul.f32 %v1200_v14, %v1200_v14  ;;  %v169_v5 = vmul.f32 %v1212_v18, %v1212_v18  ;;  %v174_v14 = vmul.f32 %v1226_v22, %v1226_v22  ;;  %v173_v18 = vmul.f32 %v1238_v26, %v1238_v26 }
  0x11   :  { %93 = vadd.xlane.f32.xlu1 %v92_v32  ;;  %v1408_v32 = vld [vmem:[%s2372_s0 + $0x158] sm:$0xff]  ;;  %v178_v22 = vmul.f32 %v1252_v30, %v1252_v30  ;;  %v177_v26 = vmul.f32 %v1264_v34, %v1264_v34  ;;  %v182_v30 = vmul.f32 %v1278_v38, %v1278_v38  ;;  %v181_v34 = vmul.f32 %v1290_v42, %v1290_v42 }
  0x12   :  { %89 = vadd.xlane.f32.xlu0 %v88_v33  ;;  %v1413_v33 = vld [vmem:[%s2372_s0 + $0x148] sm:$0xff]  ;;  %v186_v38 = vmul.f32 %v1304_v46, %v1304_v46  ;;  %v185_v42 = vmul.f32 %v1316_v50, %v1316_v50  ;;  %v190_v46 = vmul.f32 %v1330_v54, %v1330_v54  ;;  %v189_v50 = vmul.f32 %v1342_v58, %v1342_v58 }
  0x13   :  { %v143_v45 = vsel %vm62_vm0, %v1413_v33, 0.0  ;;  %v194_v54 = vmul.f32 %v1356_v62, %v1356_v62  ;;  %v193_v58 = vmul.f32 %v1368_v8, %v1368_v8  ;;  %v198_v62 = vmul.f32 %v1382_v16, %v1382_v16 }
  0x14   :  { %v144_v53 = vadd.f32 %v143_v45, %v1427_v43  ;;  %v197_v8 = vmul.f32 %v1394_v24, %v1394_v24  ;;  %v202_v16 = vmul.f32 %v1408_v32, %v1408_v32 }
  0x15   :  { %101 = vadd.xlane.f32.xlu1 %v100_v40  ;;  %v1420_v40 = vld [vmem:[%s2372_s0 + $0x150] sm:$0xff] }
  0x16   :  { %97 = vadd.xlane.f32.xlu0 %v96_v41  ;;  %v147_v41 = vsel %vm62_vm0, %v1408_v32, 0.0  ;;  %v201_v24 = vmul.f32 %v1420_v40, %v1420_v40 }
  0x17   :  { %v148_v51 = vadd.f32 %v147_v41, %v1420_v40  ;;  %v219_v41 = vsel %vm62_vm0, %v166_v25, 0.0 }
  0x19   :  { %109 = vadd.xlane.f32.xlu1 %v108_v48  ;;  %v1434_v48 = vld [vmem:[%s2372_s0 + $0x178] sm:$0xff] }
  0x1a   :  { %105 = vadd.xlane.f32.xlu0 %v104_v49  ;;  %v1439_v49 = vld [vmem:[%s2372_s0 + $0x168] sm:$0xff]  ;;  %v206_v32 = vmul.f32 %v1434_v48, %v1434_v48 }
  0x1d   :  { %117 = vadd.xlane.f32.xlu1 %v116_v56  ;;  %v1446_v56 = vld [vmem:[%s2372_s0 + $0x170] sm:$0xff] }
  0x1e   :  { %113 = vadd.xlane.f32.xlu0 %v112_v57  ;;  %v155_v57 = vsel %vm62_vm0, %v1434_v48, 0.0  ;;  %v203_v48 = vmul.f32 %v1455_v61, %v1455_v61 }
  0x1f   :  { %v156_v9 = vadd.f32 %v155_v57, %v1446_v56  ;;  %v227_v57 = vsel %vm62_vm0, %v170_v6, 0.0 }
  0x21   :  { %125 = vadd.xlane.f32.xlu1 %v124_v3  ;;  %v151_v3 = vsel %vm62_vm0, %v1439_v49, 0.0 }
  0x22   :  { %121 = vadd.xlane.f32.xlu0 %v120_v7  ;;  %v160_v7 = vmul.f32 %v1167_v4, %v1167_v4  ;;  %v152_v11 = vadd.f32 %v151_v3, %v1455_v61  ;;  %v164_v4 = vmul.f32 %v1155_v1, %v1155_v1  ;;  %v168_v1 = vmul.f32 %v1205_v15, %v1205_v15 }
  0x23   :  { %v172_v15 = vmul.f32 %v1231_v23, %v1231_v23  ;;  %v228_v3 = vadd.f32 %v227_v57, %v169_v5  ;;  %v176_v23 = vmul.f32 %v1257_v31, %v1257_v31  ;;  %v180_v31 = vmul.f32 %v1283_v39, %v1283_v39 }
  0x24   :  { %v207_v29 = vsel %vm62_vm0, %v160_v7, 0.0  ;;  %v215_v45 = vsel %vm62_vm0, %v164_v4, 0.0  ;;  %v184_v39 = vmul.f32 %v1309_v47, %v1309_v47  ;;  %v188_v47 = vmul.f32 %v1335_v55, %v1335_v55 }
  0x25   :  { %133 = vadd.xlane.f32.xlu1 %v132_v19  ;;  %v211_v19 = vsel %vm62_vm0, %v162_v59, 0.0  ;;  %v223_v59 = vsel %vm62_vm0, %v168_v1, 0.0  ;;  %v239_v25 = vsel %vm62_vm0, %v176_v23, 0.0  ;;  %v192_v55 = vmul.f32 %v1361_v63, %v1361_v63 }
  0x26   :  { %129 = vadd.xlane.f32.xlu0 %v128_v21  ;;  %v159_v21 = vmul.f32 %v1160_v2, %v1160_v2  ;;  %v163_v2 = vmul.f32 %v1150_v0, %v1150_v0  ;;  %v167_v0 = vmul.f32 %v1219_v20, %v1219_v20  ;;  %v171_v20 = vmul.f32 %v1245_v28, %v1245_v28 }
  0x27   :  { %v175_v28 = vmul.f32 %v1271_v36, %v1271_v36  ;;  %v179_v36 = vmul.f32 %v1297_v44, %v1297_v44  ;;  %v183_v44 = vmul.f32 %v1323_v52, %v1323_v52  ;;  %v255_v6 = vsel %vm62_vm0, %v184_v39, 0.0 }
  0x28   :  { %v224_v7 = vadd.f32 %v223_v59, %v167_v0  ;;  %v187_v52 = vmul.f32 %v1349_v60, %v1349_v60  ;;  %v263_v5 = vsel %vm62_vm0, %v188_v47, 0.0  ;;  %v275_v0 = vsel %vm62_vm0, %v194_v54, 0.0 }
  0x29   :  { %141 = vadd.xlane.f32.xlu1 %v140_v35  ;;  %v212_v35 = vadd.f32 %v211_v19, %v161_v13  ;;  %v231_v13 = vsel %vm62_vm0, %v172_v15, 0.0  ;;  %v240_v4 = vadd.f32 %v239_v25, %v175_v28  ;;  %v256_v1 = vadd.f32 %v255_v6, %v183_v44 }
  0x2a   :  { %137 = vadd.xlane.f32.xlu0 %v136_v37  ;;  %v208_v37 = vadd.f32 %v207_v29, %v159_v21  ;;  %v232_v19 = vadd.f32 %v231_v13, %v171_v20  ;;  %v243_v21 = vsel %vm62_vm0, %v178_v22, 0.0  ;;  %v264_v57 = vadd.f32 %v263_v5, %v187_v52 }
  0x2b   :  { %v244_v29 = vadd.f32 %v243_v21, %v177_v26  ;;  %v191_v60 = vmul.f32 %v1375_v12, %v1375_v12  ;;  %v196_v63 = vmul.f32 %v1387_v17, %v1387_v17  ;;  %v276_v59 = vadd.f32 %v275_v0, %v193_v58 }
  0x2c   :  { %v195_v12 = vmul.f32 %v1401_v27, %v1401_v27  ;;  %v200_v17 = vmul.f32 %v1413_v33, %v1413_v33  ;;  %v291_v27 = vsel %vm62_vm0, %v202_v16, 0.0  ;;  %v204_v33 = vmul.f32 %v1439_v49, %v1439_v49 }
  0x2d   :  { %149 = vadd.xlane.f32.xlu1 %v148_v51  ;;  %v220_v51 = vadd.f32 %v219_v41, %v165_v10  ;;  %v247_v10 = vsel %vm62_vm0, %v180_v31, 0.0  ;;  %v1126_v13 = vmov 0   ;;  %v292_v40 = vadd.f32 %v291_v27, %v201_v24 }
  0x2e   :  { %145 = vadd.xlane.f32.xlu0 %v144_v53  ;;  %v216_v53 = vadd.f32 %v215_v45, %v163_v2  ;;  %v248_v41 = vadd.f32 %v247_v10, %v179_v36  ;;  %v259_v2 = vsel %vm62_vm0, %v186_v38, 0.0  ;;  %v287_v22 = vsel %vm62_vm0, %v200_v17, 0.0  ;;  %1029 = vset.pattern.permute.xlu1 %v1126_v13 }
  0x2f   :  { %v260_v45 = vadd.f32 %v259_v2, %v185_v42  ;;  %1028 = vset.pattern.permute.xlu0 %v1126_v13  ;;  %v295_v26 = vsel %vm62_vm0, %v204_v33, 0.0 }
  0x30   :  { %v296_v49 = vadd.f32 %v295_v26, %v203_v48 }
  0x31   :  { %157 = vadd.xlane.f32.xlu1 %v156_v9  ;;  %v235_v9 = vsel %vm62_vm0, %v174_v14, 0.0  ;;  %v271_v14 = vsel %vm62_vm0, %v192_v55, 0.0 }
  0x32   :  { %153 = vadd.xlane.f32.xlu0 %v152_v11  ;;  %v236_v11 = vadd.f32 %v235_v9, %v173_v18  ;;  %v272_v15 = vadd.f32 %v271_v14, %v191_v60  ;;  %v279_v18 = vsel %vm62_vm0, %v196_v63, 0.0  ;;  %v199_v9 = vmul.f32 %v1427_v43, %v1427_v43 }
  0x33   :  { %v280_v20 = vadd.f32 %v279_v18, %v195_v12  ;;  %v205_v43 = vmul.f32 %v1446_v56, %v1446_v56 }
  0x34   :  { %v288_v23 = vadd.f32 %v287_v22, %v199_v9 }
  0x35   :  { %213 = vadd.xlane.f32.xlu1 %v212_v35  ;;  %v251_v35 = vsel %vm62_vm0, %v182_v30, 0.0 }
  0x36   :  { %209 = vadd.xlane.f32.xlu0 %v208_v37  ;;  %v252_v37 = vadd.f32 %v251_v35, %v181_v34 }
  0x39   :  { %221 = vadd.xlane.f32.xlu1 %v220_v51  ;;  %v267_v51 = vsel %vm62_vm0, %v190_v46, 0.0 }
  0x3a   :  { %217 = vadd.xlane.f32.xlu0 %v216_v53  ;;  %v268_v53 = vadd.f32 %v267_v51, %v189_v50 }
  0x3d   :  { %229 = vadd.xlane.f32.xlu1 %v228_v3  ;;  %v283_v3 = vsel %vm62_vm0, %v198_v62, 0.0 }
  0x3e   :  { %225 = vadd.xlane.f32.xlu0 %v224_v7  ;;  %v284_v7 = vadd.f32 %v283_v3, %v197_v8 }
  0x41   :  { %237 = vadd.xlane.f32.xlu1 %v236_v11  ;;  %v299_v11 = vsel %vm62_vm0, %v206_v32, 0.0 }
  0x42   :  { %233 = vadd.xlane.f32.xlu0 %v232_v19  ;;  %v300_v19 = vadd.f32 %v299_v11, %v205_v43 }
  0x45   :  { %245 = vadd.xlane.f32.xlu1 %v244_v29 }
  0x46   :  { %241 = vadd.xlane.f32.xlu0 %v240_v4 }
  0x49   :  { %253 = vadd.xlane.f32.xlu1 %v252_v37 }
  0x4a   :  { %249 = vadd.xlane.f32.xlu0 %v248_v41 }
  0x4d   :  { %261 = vadd.xlane.f32.xlu1 %v260_v45 }
  0x4e   :  { %257 = vadd.xlane.f32.xlu0 %v256_v1 }
  0x51   :  { %269 = vadd.xlane.f32.xlu1 %v268_v53 }
  0x52   :  { %265 = vadd.xlane.f32.xlu0 %v264_v57 }
  0x55   :  { %277 = vadd.xlane.f32.xlu1 %v276_v59 }
  0x56   :  { %273 = vadd.xlane.f32.xlu0 %v272_v15 }
  0x59   :  { %285 = vadd.xlane.f32.xlu1 %v284_v7 }
  0x5a   :  { %281 = vadd.xlane.f32.xlu0 %v280_v20 }
  0x5d   :  { %293 = vadd.xlane.f32.xlu1 %v292_v40 }
  0x5e   :  { %289 = vadd.xlane.f32.xlu0 %v288_v23 }
  0x61   :  { %301 = vadd.xlane.f32.xlu1 %v300_v19 }
  0x62   :  { %297 = vadd.xlane.f32.xlu0 %v296_v49 }
  0x8e   :  { %v74_v21 = vpop.xlane.xlu1 %73 }
  0x8f   :  { %v66_v28 = vpop.xlane.xlu0 %65  ;;  %v1617_v53 = vmul.f32 0.0069444445, %v74_v21 }
  0x90   :  { %v1611_v1 = vmul.f32 0.0069444445, %v66_v28 }
  0x91   :  { %v353_v3 = vmul.f32 %v1617_v53, %v1617_v53 }
  0x92   :  { %v78_v30 = vpop.xlane.xlu1 %77  ;;  %v351_v58 = vmul.f32 %v1611_v1, %v1611_v1 }
  0x93   :  { %v70_v25 = vpop.xlane.xlu0 %69  ;;  %v1613_v52 = vmul.f32 0.0069444445, %v78_v30 }
  0x94   :  { %v1607_v45 = vmul.f32 0.0069444445, %v70_v25 }
  0x95   :  { %v354_v63 = vmul.f32 %v1613_v52, %v1613_v52 }
  0x96   :  { %v86_v56 = vpop.xlane.xlu1 %85  ;;  %v352_v54 = vmul.f32 %v1607_v45, %v1607_v45 }
  0x97   :  { %v82_v31 = vpop.xlane.xlu0 %81  ;;  %v1621_v60 = vmul.f32 0.0069444445, %v86_v56 }
  0x98   :  { %v1627_v12 = vmul.f32 0.0069444445, %v82_v31 }
  0x99   :  { %v356_v24 = vmul.f32 %v1621_v60, %v1621_v60 }
  0x9a   :  { %v94_v29 = vpop.xlane.xlu1 %93  ;;  %v355_v40 = vmul.f32 %v1627_v12, %v1627_v12 }
  0x9b   :  { %v90_v34 = vpop.xlane.xlu0 %89  ;;  %v1635_v11 = vmul.f32 0.0069444445, %v94_v29 }
  0x9c   :  { %v1631_v32 = vmul.f32 0.0069444445, %v90_v34 }
  0x9e   :  { %v102_v4 = vpop.xlane.xlu1 %101  ;;  %v357_v28 = vmul.f32 %v1631_v32, %v1631_v32 }
  0x9f   :  { %v1579_v35 = vpop.xlane.xlu0 %97  ;;  %v1639_v30 = vmul.f32 0.0069444445, %v102_v4 }
  0xa2   :  { %v1581_v61 = vpop.xlane.xlu1 %109 }
  0xa3   :  { %v1583_v36 = vpop.xlane.xlu0 %105  ;;  %v1649_v4 = vmul.f32 0.0069444445, %v1581_v61 }
  0xa6   :  { %v1585_v38 = vpop.xlane.xlu1 %117 }
  0xa7   :  { %v1587_v10 = vpop.xlane.xlu0 %113 }
  0xaa   :  { %v1589_v39 = vpop.xlane.xlu1 %125 }
  0xab   :  { %v1591_v37 = vpop.xlane.xlu0 %121 }
  0xae   :  { %v1593_v42 = vpop.xlane.xlu1 %133 }
  0xaf   :  { %v1595_v41 = vpop.xlane.xlu0 %129 }
  0xb2   :  { %v1597_v2 = vpop.xlane.xlu1 %141 }
  0xb3   :  { %v1599_v44 = vpop.xlane.xlu0 %137 }
  0xb6   :  { %v1601_v46 = vpop.xlane.xlu1 %149 }
  0xb7   :  { %v1603_v6 = vpop.xlane.xlu0 %145 }
  0xba   :  { %v1605_v47 = vpop.xlane.xlu1 %157 }
  0xbb   :  { %v1609_v50 = vpop.xlane.xlu0 %153 }
  0xbe   :  { %v214_v51 = vpop.xlane.xlu1 %213 }
  0xbf   :  { %v328_v5 = vmul.f32 0.0069444445, %v214_v51  ;;  %v210_v55 = vpop.xlane.xlu0 %209  ;;  %v358_v51 = vmul.f32 %v1635_v11, %v1635_v11 }
  0xc0   :  { %v327_v57 = vmul.f32 0.0069444445, %v210_v55 }
  0xc1   :  { %v376_v0 = vsub.f32 %v328_v5, %v352_v54 }
  0xc2   :  { %v375_v62 = vsub.f32 %v327_v57, %v351_v58  ;;  %v222_v14 = vpop.xlane.xlu1 %221  ;;  %v360_v58 = vmul.f32 %v1639_v30, %v1639_v30  ;;  %v1646_v57 = vmul.f32 0.0069444445, %v1579_v35  ;;  %v472_v35 = vld [vmem:[%s2373_s1 + $0x8] sm:$0xff] }
  0xc3   :  { %v400_v59 = vmax.f32 %v376_v0, 0.0  ;;  %v330_v8 = vmul.f32 0.0069444445, %v222_v14  ;;  %v218_v15 = vpop.xlane.xlu0 %217  ;;  %v1652_v14 = vmul.f32 0.0069444445, %v1585_v38 }
  0xc4   :  { %v399_v16 = vmax.f32 %v375_v62, 0.0  ;;  %v329_v18 = vmul.f32 0.0069444445, %v218_v15  ;;  %v359_v61 = vmul.f32 %v1646_v57, %v1646_v57 }
  0xc5   :  { %v424_v17 = vadd.f32 0.001, %v400_v59  ;;  %v378_v7 = vsub.f32 %v330_v8, %v354_v63 }
  0xc6   :  { %v423_v9 = vadd.f32 0.001, %v399_v16  ;;  %v377_v20 = vsub.f32 %v329_v18, %v353_v3  ;;  %v230_v27 = vpop.xlane.xlu1 %229  ;;  %v362_v18 = vmul.f32 %v1649_v4, %v1649_v4 }
  0xc7   :  { %1030 = vrsqrt.f32 %v424_v17  ;;  %v402_v22 = vmax.f32 %v378_v7, 0.0  ;;  %v332_v33 = vmul.f32 0.0069444445, %v230_v27  ;;  %v226_v13 = vpop.xlane.xlu0 %225  ;;  %v364_v27 = vmul.f32 %v1652_v14, %v1652_v14 }
  0xc8   :  { %1032 = vrsqrt.f32 %v423_v9  ;;  %v401_v43 = vmax.f32 %v377_v20, 0.0  ;;  %v331_v23 = vmul.f32 0.0069444445, %v226_v13  ;;  %v1665_v20 = vmul.f32 0.0069444445, %v1583_v36 }
  0xc9   :  { %v426_v48 = vadd.f32 0.001, %v402_v22  ;;  %v380_v19 = vsub.f32 %v332_v33, %v356_v24  ;;  %v471_v24 = vld [vmem:[%s2373_s1] sm:$0xff]  ;;  %v1670_v22 = vmul.f32 0.0069444445, %v1587_v10 }
  0xca   :  { %v425_v26 = vadd.f32 0.001, %v401_v43  ;;  %v379_v49 = vsub.f32 %v331_v23, %v355_v40  ;;  %v238_v21 = vpop.xlane.xlu1 %237  ;;  %v1677_v36 = vmul.f32 0.0069444445, %v1589_v39 }
  0xcb   :  { %v234_v25 = vpop.xlane.xlu0 %233  ;;  %v334_v31 = vmul.f32 0.0069444445, %v238_v21  ;;  %v404_v29 = vmax.f32 %v380_v19, 0.0 }
  0xcc   :  { %1034 = vrsqrt.f32 %v425_v26  ;;  %v403_v56 = vmax.f32 %v379_v49, 0.0  ;;  %v333_v34 = vmul.f32 0.0069444445, %v234_v25 }
  0xcd   :  { %1036 = vrsqrt.f32 %v426_v48  ;;  %v382_v63 = vsub.f32 %v334_v31, %v358_v51  ;;  %v428_v15 = vadd.f32 0.001, %v404_v29  ;;  %v361_v31 = vmul.f32 %v1665_v20, %v1665_v20 }
  0xce   :  { %v427_v54 = vadd.f32 0.001, %v403_v56  ;;  %v381_v5 = vsub.f32 %v333_v34, %v357_v28  ;;  %v246_v55 = vpop.xlane.xlu1 %245  ;;  %v473_v56 = vld [vmem:[%s2373_s1 + $0x10] sm:$0xff]  ;;  %v363_v34 = vmul.f32 %v1670_v22, %v1670_v22 }
  0xcf   :  { %v336_v0 = vmul.f32 0.0069444445, %v246_v55  ;;  %v242_v62 = vpop.xlane.xlu0 %241  ;;  %v406_v33 = vmax.f32 %v382_v63, 0.0 }
  0xd0   :  { %v335_v8 = vmul.f32 0.0069444445, %v242_v62  ;;  %1038 = vrsqrt.f32 %v427_v54  ;;  %v405_v3 = vmax.f32 %v381_v5, 0.0  ;;  %v1689_v54 = vmul.f32 0.0069444445, %v1591_v37 }
  0xd1   :  { %v384_v59 = vsub.f32 %v336_v0, %v360_v58  ;;  %1040 = vrsqrt.f32 %v428_v15  ;;  %v430_v51 = vadd.f32 0.001, %v406_v33  ;;  %v1692_v0 = vmul.f32 0.0069444445, %v1593_v42 }
  0xd2   :  { %v254_v16 = vpop.xlane.xlu1 %253  ;;  %v383_v43 = vsub.f32 %v335_v8, %v359_v61  ;;  %v429_v26 = vadd.f32 0.001, %v405_v3  ;;  %v366_v15 = vmul.f32 %v1677_v36, %v1677_v36 }
  0xd3   :  { %v408_v17 = vmax.f32 %v384_v59, 0.0  ;;  %v338_v38 = vmul.f32 0.0069444445, %v254_v16  ;;  %v250_v7 = vpop.xlane.xlu0 %249 }
  0xd4   :  { %v1031_v9 = vpop.eup %1030  ;;  %v337_v19 = vmul.f32 0.0069444445, %v250_v7  ;;  %v407_v5 = vmax.f32 %v383_v43, 0.0  ;;  %v365_v7 = vmul.f32 %v1689_v54, %v1689_v54 }
  0xd5   :  { %v1033_v13 = vpop.eup %1032  ;;  %v432_v40 = vadd.f32 0.001, %v408_v17  ;;  %v386_v23 = vsub.f32 %v338_v38, %v362_v18  ;;  %v1672_v48 = vmul.f32 %v1031_v9, %v472_v35  ;;  %v474_v35 = vld [vmem:[%s2373_s1 + $0x18] sm:$0xff] }
  0xd6   :  { %v262_v49 = vpop.xlane.xlu1 %261  ;;  %v1674_v21 = vmul.f32 %v1033_v13, %v471_v24  ;;  %v385_v62 = vsub.f32 %v337_v19, %v361_v31  ;;  %v431_v61 = vadd.f32 0.001, %v407_v5  ;;  %v368_v24 = vmul.f32 %v1692_v0, %v1692_v0  ;;  %v475_v19 = vld [vmem:[%s2373_s1 + $0x20] sm:$0xff] }
  0xd7   :  { %1042 = vrsqrt.f32 %v432_v40  ;;  %v410_v28 = vmax.f32 %v386_v23, 0.0  ;;  %v340_v10 = vmul.f32 0.0069444445, %v262_v49  ;;  %v258_v25 = vpop.xlane.xlu0 %257  ;;  %598 = vperm.xlu1 %1029, %v1672_v48   ;;  %v1709_v40 = vmul.f32 0.0069444445, %v1597_v2 }
  0xd8   :  { %v339_v29 = vmul.f32 0.0069444445, %v258_v25  ;;  %593 = vperm.xlu0 %1028, %v1674_v21   ;;  %1044 = vrsqrt.f32 %v429_v26  ;;  %v409_v9 = vmax.f32 %v385_v62, 0.0  ;;  %v1715_v49 = vmul.f32 0.0069444445, %v1595_v41  ;;  %v480_v41 = vld [vmem:[%s2373_s1 + $0x48] sm:$0xff] }
  0xd9   :  { %v1035_v39 = vpop.eup %1034  ;;  %v434_v55 = vadd.f32 0.001, %v410_v28  ;;  %v388_v58 = vsub.f32 %v340_v10, %v364_v27  ;;  %v1718_v28 = vmul.f32 0.0069444445, %v1601_v46  ;;  %v370_v46 = vmul.f32 %v1709_v40, %v1709_v40  ;;  %v476_v62 = vld [vmem:[%s2373_s1 + $0x28] sm:$0xff] }
  0xda   :  { %v270_v63 = vpop.xlane.xlu1 %269  ;;  %v1694_v59 = vmul.f32 %v1035_v39, %v473_v56  ;;  %v1037_v8 = vpop.eup %1036  ;;  %v387_v42 = vsub.f32 %v339_v29, %v363_v34  ;;  %v433_v31 = vadd.f32 0.001, %v409_v9  ;;  %v1747_v9 = vmul.f32 0.0069444445, %v1605_v47 }
  0xdb   :  { %1046 = vrsqrt.f32 %v434_v55  ;;  %v412_v3 = vmax.f32 %v388_v58, 0.0  ;;  %v342_v16 = vmul.f32 0.0069444445, %v270_v63  ;;  %v266_v37 = vpop.xlane.xlu0 %265  ;;  %v1706_v33 = vmul.f32 %v1037_v8, %v474_v35 }
  0xdc   :  { %1048 = vrsqrt.f32 %v430_v51  ;;  %603 = vperm.xlu1 %1029, %v1694_v59   ;;  %v341_v38 = vmul.f32 0.0069444445, %v266_v37  ;;  %v411_v10 = vmax.f32 %v387_v42, 0.0  ;;  %v367_v8 = vmul.f32 %v1715_v49, %v1715_v49 }
  0xdd   :  { %v436_v18 = vadd.f32 0.001, %v412_v3  ;;  %v390_v17 = vsub.f32 %v342_v16, %v366_v15  ;;  %v1039_v13 = vpop.eup %1038  ;;  %v1734_v15 = vmul.f32 0.0069444445, %v1599_v44  ;;  %v372_v3 = vmul.f32 %v1718_v28, %v1718_v28  ;;  %v482_v44 = vld [vmem:[%s2373_s1 + $0x58] sm:$0xff] }
  0xde   :  { %v278_v27 = vpop.xlane.xlu1 %277  ;;  %v389_v25 = vsub.f32 %v341_v38, %v365_v7  ;;  %v1721_v29 = vmul.f32 %v1039_v13, %v475_v19  ;;  %v1041_v39 = vpop.eup %1040  ;;  %v435_v16 = vadd.f32 0.001, %v411_v10  ;;  %v1756_v10 = vmul.f32 0.0069444445, %v1603_v6  ;;  %v484_v6 = vld [vmem:[%s2373_s1 + $0x68] sm:$0xff] }
  0xdf   :  { %1050 = vrsqrt.f32 %v436_v18  ;;  %v414_v43 = vmax.f32 %v390_v17, 0.0  ;;  %v344_v23 = vmul.f32 0.0069444445, %v278_v27  ;;  %v274_v26 = vpop.xlane.xlu0 %273  ;;  %v1741_v7 = vmul.f32 %v1041_v39, %v476_v62 }
  0xe0   :  { %608 = vperm.xlu1 %1029, %v1706_v33   ;;  %1052 = vrsqrt.f32 %v431_v61  ;;  %v343_v34 = vmul.f32 0.0069444445, %v274_v26  ;;  %v413_v37 = vmax.f32 %v389_v25, 0.0  ;;  %v369_v19 = vmul.f32 %v1734_v15, %v1734_v15 }
  0xe1   :  { %v438_v2 = vadd.f32 0.001, %v414_v43  ;;  %v392_v56 = vsub.f32 %v344_v23, %v368_v24  ;;  %v477_v23 = vld [vmem:[%s2373_s1 + $0x30] sm:$0xff] }
  0xe2   :  { %v286_v51 = vpop.xlane.xlu1 %285  ;;  %v391_v18 = vsub.f32 %v343_v34, %v367_v8  ;;  %v478_v34 = vld [vmem:[%s2373_s1 + $0x38] sm:$0xff] }
  0xe3   :  { %1054 = vrsqrt.f32 %v438_v2  ;;  %v416_v5 = vmax.f32 %v392_v56, 0.0  ;;  %v346_v55 = vmul.f32 0.0069444445, %v286_v51  ;;  %v282_v58 = vpop.xlane.xlu0 %281  ;;  %v437_v2 = vadd.f32 0.001, %v413_v37 }
  0xe4   :  { %v1043_v63 = vpop.eup %1042  ;;  %613 = vperm.xlu1 %1029, %v1721_v29   ;;  %1056 = vrsqrt.f32 %v433_v31  ;;  %v345_v17 = vmul.f32 0.0069444445, %v282_v58  ;;  %v415_v51 = vmax.f32 %v391_v18, 0.0 }
  0xe5   :  { %v440_v35 = vadd.f32 0.001, %v416_v5  ;;  %v394_v42 = vsub.f32 %v346_v55, %v370_v46  ;;  %v1739_v61 = vmul.f32 %v1043_v63, %v480_v41  ;;  %v1045_v24 = vpop.eup %1044  ;;  %v374_v55 = vmul.f32 %v1747_v9, %v1747_v9 }
  0xe6   :  { %v294_v38 = vpop.xlane.xlu1 %293  ;;  %v393_v41 = vsub.f32 %v345_v17, %v369_v19  ;;  %v1764_v5 = vmul.f32 %v1045_v24, %v477_v23  ;;  %v479_v17 = vld [vmem:[%s2373_s1 + $0x40] sm:$0xff] }
  0xe7   :  { %1058 = vrsqrt.f32 %v440_v35  ;;  %v418_v27 = vmax.f32 %v394_v42, 0.0  ;;  %v348_v13 = vmul.f32 0.0069444445, %v294_v38  ;;  %v290_v43 = vpop.xlane.xlu0 %289  ;;  %638 = vperm.xlu0 %1028, %v1739_v61  }
  0xe8   :  { %v1047_v26 = vpop.eup %1046  ;;  %1060 = vrsqrt.f32 %v435_v16  ;;  %618 = vperm.xlu1 %1029, %v1741_v7   ;;  %v347_v39 = vmul.f32 0.0069444445, %v290_v43  ;;  %v1775_v16 = vmul.f32 0.0069444445, %v1609_v50  ;;  %v417_v24 = vmax.f32 %v393_v41, 0.0  ;;  %v486_v50 = vld [vmem:[%s2373_s1 + $0x78] sm:$0xff] }
  0xe9   :  { %v1049_v47 = vpop.eup %1048  ;;  %v442_v25 = vadd.f32 0.001, %v418_v27  ;;  %v396_v56 = vsub.f32 %v348_v13, %v372_v3  ;;  %v1759_v31 = vmul.f32 %v1047_v26, %v482_v44  ;;  %v371_v3 = vmul.f32 %v1756_v10, %v1756_v10 }
  0xea   :  { %v302_v46 = vpop.xlane.xlu1 %301  ;;  %v1778_v37 = vmul.f32 %v1049_v47, %v478_v34  ;;  %v439_v44 = vadd.f32 0.001, %v415_v51  ;;  %v373_v26 = vmul.f32 %v1775_v16, %v1775_v16  ;;  %v488_v51 = vld [vmem:[%s2373_s1 + $0x88] sm:$0xff] }
  0xeb   :  { %1062 = vrsqrt.f32 %v442_v25  ;;  %v420_v58 = vmax.f32 %v396_v56, 0.0  ;;  %v350_v62 = vmul.f32 0.0069444445, %v302_v46  ;;  %v298_v63 = vpop.xlane.xlu0 %297  ;;  %648 = vperm.xlu0 %1028, %v1759_v31   ;;  %v395_v27 = vsub.f32 %v347_v39, %v371_v3  ;;  %v481_v39 = vld [vmem:[%s2373_s1 + $0x50] sm:$0xff]  ;;  %v483_v3 = vld [vmem:[%s2373_s1 + $0x60] sm:$0xff] }
  0xec   :  { %v1051_v8 = vpop.eup %1050  ;;  %623 = vperm.xlu1 %1029, %v1764_v5   ;;  %1064 = vrsqrt.f32 %v437_v2  ;;  %v349_v13 = vmul.f32 0.0069444445, %v298_v63  ;;  %v441_v25 = vadd.f32 0.001, %v417_v24  ;;  %v492_v24 = vld [vmem:[%s2373_s1 + $0xa8] sm:$0xff] }
  0xed   :  { %v444_v35 = vadd.f32 0.001, %v420_v58  ;;  %v398_v42 = vsub.f32 %v350_v62, %v374_v55  ;;  %v1780_v18 = vmul.f32 %v1051_v8, %v484_v6  ;;  %v1053_v38 = vpop.eup %1052  ;;  %v419_v56 = vmax.f32 %v395_v27, 0.0  ;;  %v490_v8 = vld [vmem:[%s2373_s1 + $0x98] sm:$0xff]  ;;  %v485_v27 = vld [vmem:[%s2373_s1 + $0x70] sm:$0xff] }
  0xee   :  { %v1794_v2 = vmul.f32 %v1053_v38, %v479_v17  ;;  %v397_v34 = vsub.f32 %v349_v13, %v373_v26 }
  0xef   :  { %1066 = vrsqrt.f32 %v444_v35  ;;  %v422_v43 = vmax.f32 %v398_v42, 0.0  ;;  %658 = vperm.xlu0 %1028, %v1780_v18   ;;  %v443_v58 = vadd.f32 0.001, %v419_v56 }
  0xf0   :  { %v1055_v23 = vpop.eup %1054  ;;  %628 = vperm.xlu1 %1029, %v1778_v37   ;;  %1068 = vrsqrt.f32 %v439_v44  ;;  %v421_v62 = vmax.f32 %v397_v34, 0.0  ;;  %v544_v34 = vmul.f32 %v1672_v48, %v1607_v45  ;;  %v522_v48 = vld [vmem:[%s2374_s2 + $0x18] sm:$0xff] }
  0xf1   :  { %v446_v19 = vadd.f32 0.001, %v422_v43  ;;  %v1792_v47 = vmul.f32 %v1055_v23, %v486_v50  ;;  %v1057_v41 = vpop.eup %1056  ;;  %v494_v23 = vld [vmem:[%s2373_s1 + $0xb8] sm:$0xff] }
  0xf2   :  { %v1806_v63 = vmul.f32 %v1057_v41, %v481_v39  ;;  %v445_v38 = vadd.f32 0.001, %v421_v62  ;;  %v520_v41 = vld [vmem:[%s2374_s2 + $0x8] sm:$0xff] }
  0xf3   :  { %1070 = vrsqrt.f32 %v446_v19  ;;  %668 = vperm.xlu0 %1028, %v1792_v47   ;;  %v487_v19 = vld [vmem:[%s2373_s1 + $0x80] sm:$0xff] }
  0xf4   :  { %v1059_v46 = vpop.eup %1058  ;;  %633 = vperm.xlu1 %1029, %v1794_v2   ;;  %1072 = vrsqrt.f32 %v441_v25 }
  0xf5   :  { %v1061_v6 = vpop.eup %1060  ;;  %v1804_v55 = vmul.f32 %v1059_v46, %v488_v51  ;;  %1074 = vrsqrt.f32 %v443_v58  ;;  %v489_v46 = vld [vmem:[%s2373_s1 + $0x90] sm:$0xff]  ;;  %v546_v58 = vmul.f32 %v1706_v33, %v1613_v52  ;;  %v524_v52 = vld [vmem:[%s2374_s2 + $0x28] sm:$0xff] }
  0xf6   :  { %v1818_v44 = vmul.f32 %v1061_v6, %v483_v3  ;;  %1076 = vrsqrt.f32 %v445_v38  ;;  %v568_v6 = vsub.f32 %v520_v41, %v544_v34  ;;  %v493_v38 = vld [vmem:[%s2373_s1 + $0xb0] sm:$0xff]  ;;  %v554_v34 = vmul.f32 %v1759_v31, %v1649_v4  ;;  %v532_v4 = vld [vmem:[%s2374_s2 + $0x68] sm:$0xff] }
  0xf7   :  { %678 = vperm.xlu0 %1028, %v1804_v55   ;;  %v570_v3 = vsub.f32 %v522_v48, %v546_v58  ;;  %v549_v31 = vmul.f32 %v1764_v5, %v1631_v32  ;;  %v527_v32 = vld [vmem:[%s2374_s2 + $0x40] sm:$0xff]  ;;  %v560_v48 = vmul.f32 %v1804_v55, %v1692_v0  ;;  %v538_v0 = vld [vmem:[%s2374_s2 + $0x98] sm:$0xff] }
  0xf8   :  { %v1063_v35 = vpop.eup %1062  ;;  %643 = vperm.xlu1 %1029, %v1806_v63   ;;  %v555_v55 = vmul.f32 %v1818_v44, %v1670_v22  ;;  %v533_v22 = vld [vmem:[%s2374_s2 + $0x70] sm:$0xff] }
  0xf9   :  { %v1816_v42 = vmul.f32 %v1063_v35, %v490_v8  ;;  %v1065_v17 = vpop.eup %1064  ;;  %v491_v8 = vld [vmem:[%s2373_s1 + $0xa0] sm:$0xff]  ;;  %v548_v35 = vmul.f32 %v1741_v7, %v1621_v60  ;;  %v526_v60 = vld [vmem:[%s2374_s2 + $0x38] sm:$0xff]  ;;  %v543_v7 = vmul.f32 %v1674_v21, %v1611_v1  ;;  %v521_v1 = vld [vmem:[%s2374_s2 + $0x10] sm:$0xff] }
  0xfa   :  { %v1830_v43 = vmul.f32 %v1065_v17, %v485_v27  ;;  %v550_v27 = vmul.f32 %v1778_v37, %v1635_v11  ;;  %v552_v11 = vmul.f32 %v1739_v61, %v1639_v30  ;;  %v530_v30 = vld [vmem:[%s2374_s2 + $0x58] sm:$0xff]  ;;  %v547_v61 = vmul.f32 %v1721_v29, %v1627_v12  ;;  %v525_v12 = vld [vmem:[%s2374_s2 + $0x30] sm:$0xff] }
  0xfb   :  { %688 = vperm.xlu0 %1028, %v1816_v42   ;;  %v573_v58 = vsub.f32 %v525_v12, %v549_v31  ;;  %v1078_v31 = vld [vmem:[%s2372_s0 + $0x10] sm:$0xff] }
  0xfc   :  { %v1067_v13 = vpop.eup %1066  ;;  %653 = vperm.xlu1 %1029, %v1818_v44  }
  0xfd   :  { %v1828_v50 = vmul.f32 %v1067_v13, %v492_v24  ;;  %v1069_v26 = vpop.eup %1068  ;;  %v572_v24 = vsub.f32 %v524_v52, %v548_v35 }
  0xfe   :  { %v1844_v51 = vmul.f32 %v1069_v26, %v487_v19  ;;  %v574_v26 = vsub.f32 %v526_v60, %v550_v27  ;;  %v528_v19 = vld [vmem:[%s2374_s2 + $0x48] sm:$0xff] }
  0xff   :  { %698 = vperm.xlu0 %1028, %v1828_v50   ;;  %v576_v21 = vsub.f32 %v528_v19, %v552_v11  ;;  %v564_v35 = vmul.f32 %v1828_v50, %v1718_v28  ;;  %v542_v28 = vld [vmem:[%s2374_s2 + $0xb8] sm:$0xff] }
 0x100   :  { %v1071_v25 = vpop.eup %1070  ;;  %663 = vperm.xlu1 %1029, %v1830_v43   ;;  %v559_v50 = vmul.f32 %v1844_v51, %v1715_v49 }
 0x101   :  { %v1840_v56 = vmul.f32 %v1071_v25, %v494_v23  ;;  %v1073_v39 = vpop.eup %1072  ;;  %v519_v23 = vld [vmem:[%s2374_s2] sm:$0xff]  ;;  %v545_v25 = vmul.f32 %v1694_v59, %v1617_v53  ;;  %v578_v59 = vsub.f32 %v530_v30, %v554_v34 }
 0x102   :  { %v1856_v45 = vmul.f32 %v1073_v39, %v489_v46  ;;  %v1075_v62 = vpop.eup %1074  ;;  %v567_v37 = vsub.f32 %v519_v23, %v543_v7  ;;  %v523_v53 = vld [vmem:[%s2374_s2 + $0x20] sm:$0xff]  ;;  %v556_v39 = vmul.f32 %v1780_v18, %v1652_v14  ;;  %v534_v14 = vld [vmem:[%s2374_s2 + $0x78] sm:$0xff]  ;;  %v551_v18 = vmul.f32 %v1794_v2, %v1646_v57  ;;  %v529_v57 = vld [vmem:[%s2374_s2 + $0x50] sm:$0xff] }
 0x103   :  { %708 = vperm.xlu0 %1028, %v1840_v56   ;;  %v1867_v17 = vmul.f32 %v1075_v62, %v491_v8  ;;  %v1077_v33 = vpop.eup %1076  ;;  %v569_v41 = vsub.f32 %v521_v1, %v545_v25  ;;  %v571_v46 = vsub.f32 %v523_v53, %v547_v61  ;;  %v562_v8 = vmul.f32 %v1816_v42, %v1709_v40  ;;  %v540_v40 = vld [vmem:[%s2374_s2 + $0xa8] sm:$0xff] }
 0x104   :  { %673 = vperm.xlu1 %1029, %v1844_v51   ;;  %v1878_v13 = vmul.f32 %v1077_v33, %v493_v38  ;;  %v580_v29 = vsub.f32 %v532_v4, %v556_v39  ;;  %v575_v62 = vsub.f32 %v527_v32, %v551_v18  ;;  %v557_v42 = vmul.f32 %v1830_v43, %v1689_v54  ;;  %v535_v54 = vld [vmem:[%s2374_s2 + $0x80] sm:$0xff] }
 0x105   :  { %v588_v44 = vsub.f32 %v540_v40, %v564_v35  ;;  %v566_v33 = vmul.f32 %v1840_v56, %v1747_v9  ;;  %v561_v27 = vmul.f32 %v1856_v45, %v1734_v15  ;;  %v537_v9 = vld [vmem:[%s2374_s2 + $0x90] sm:$0xff]  ;;  %v563_v49 = vmul.f32 %v1867_v17, %v1756_v10  ;;  %v539_v51 = vld [vmem:[%s2374_s2 + $0xa0] sm:$0xff] }
 0x106   :  { %v581_v38 = vsub.f32 %v533_v22, %v557_v42  ;;  %v565_v60 = vmul.f32 %v1878_v13, %v1775_v16  ;;  %v541_v15 = vld [vmem:[%s2374_s2 + $0xb0] sm:$0xff] }
 0x107   :  { %766 = vperm.xlu0 %1028, %v568_v6   ;;  %v558_v6 = vmul.f32 %v1792_v47, %v1677_v36  ;;  %v536_v36 = vld [vmem:[%s2374_s2 + $0x88] sm:$0xff]  ;;  %v553_v47 = vmul.f32 %v1806_v63, %v1665_v20  ;;  %v531_v20 = vld [vmem:[%s2374_s2 + $0x60] sm:$0xff]  ;;  %v586_v63 = vsub.f32 %v538_v0, %v562_v8  ;;  %v590_v43 = vsub.f32 %v542_v28, %v566_v33 }
 0x108   :  { %683 = vperm.xlu1 %1029, %v1856_v45   ;;  %v584_v2 = vsub.f32 %v536_v36, %v560_v48  ;;  %v579_v52 = vsub.f32 %v531_v20, %v555_v55  ;;  %v585_v56 = vsub.f32 %v537_v9, %v561_v27  ;;  %v587_v7 = vsub.f32 %v539_v51, %v563_v49  ;;  %v1082_v55 = vld [vmem:[%s2372_s0 + $0x50] sm:$0xff]  ;;  %v1086_v27 = vld [vmem:[%s2372_s0] sm:$0xff]  ;;  %v1087_v49 = vld [vmem:[%s2372_s0 + $0x8] sm:$0xff] }
 0x109   :  { %v582_v5 = vsub.f32 %v534_v14, %v558_v6  ;;  %v589_v45 = vsub.f32 %v541_v15, %v565_v60 }
 0x10b   :  { %776 = vperm.xlu0 %1028, %v570_v3   ;;  %v577_v3 = vsub.f32 %v529_v57, %v553_v47 }
 0x10c   :  { %693 = vperm.xlu1 %1029, %v1867_v17  }
 0x10f   :  { %786 = vperm.xlu0 %1028, %v572_v24   ;;  %v583_v24 = vsub.f32 %v535_v54, %v559_v50  ;;  %v1085_v50 = vld [vmem:[%s2372_s0 + $0x78] sm:$0xff] }
 0x110   :  { %703 = vperm.xlu1 %1029, %v1878_v13  }
 0x113   :  { %796 = vperm.xlu0 %1028, %v574_v26  }
 0x114   :  { %761 = vperm.xlu1 %1029, %v567_v37  }
 0x117   :  { %806 = vperm.xlu0 %1028, %v576_v21  }
 0x118   :  { %771 = vperm.xlu1 %1029, %v569_v41  }
 0x11b   :  { %816 = vperm.xlu0 %1028, %v578_v59  }
 0x11c   :  { %781 = vperm.xlu1 %1029, %v571_v46  }
 0x11f   :  { %826 = vperm.xlu0 %1028, %v580_v29   ;;  %v1079_v29 = vld [vmem:[%s2372_s0 + $0x18] sm:$0xff] }
 0x120   :  { %791 = vperm.xlu1 %1029, %v573_v58  }
 0x123   :  { %836 = vperm.xlu0 %1028, %v582_v5   ;;  %v1080_v5 = vld [vmem:[%s2372_s0 + $0x30] sm:$0xff] }
 0x124   :  { %801 = vperm.xlu1 %1029, %v575_v62   ;;  %v1081_v62 = vld [vmem:[%s2372_s0 + $0x38] sm:$0xff] }
 0x127   :  { %846 = vperm.xlu0 %1028, %v584_v2  }
 0x128   :  { %811 = vperm.xlu1 %1029, %v577_v3  }
 0x12b   :  { %856 = vperm.xlu0 %1028, %v586_v63   ;;  %v1083_v63 = vld [vmem:[%s2372_s0 + $0x58] sm:$0xff] }
 0x12c   :  { %821 = vperm.xlu1 %1029, %v579_v52  }
 0x12f   :  { %866 = vperm.xlu0 %1028, %v588_v44  }
 0x130   :  { %831 = vperm.xlu1 %1029, %v581_v38   ;;  %v1084_v38 = vld [vmem:[%s2372_s0 + $0x70] sm:$0xff] }
 0x133   :  { %876 = vperm.xlu0 %1028, %v590_v43  }
 0x134   :  { %841 = vperm.xlu1 %1029, %v583_v24  }
 0x138   :  { %851 = vperm.xlu1 %1029, %v585_v56  }
 0x13c   :  { %861 = vperm.xlu1 %1029, %v587_v7  }
 0x140   :  { %871 = vperm.xlu1 %1029, %v589_v45  }
 0x152   :  { %v599_v23 = vpop.permute.xlu1 %598 }
 0x153   :  { %v594_v17 = vpop.permute.xlu0 %593  ;;  %v713_v12 = vmul.f32 %v1078_v31, %v599_v23  ;;  %v714_v6 = vmul.f32 %v1079_v29, %v599_v23  ;;  %v1090_v29 = vld [vmem:[%s2372_s0 + $0x20] sm:$0xff] }
 0x154   :  { %v711_v9 = vmul.f32 %v1086_v27, %v594_v17  ;;  %v712_v56 = vmul.f32 %v1087_v49, %v594_v17 }
 0x157   :  { %v1984_v26 = vpop.permute.xlu1 %603 }
 0x15b   :  { %v609_v10 = vpop.permute.xlu1 %608 }
 0x15c   :  { %v717_v48 = vmul.f32 %v1080_v5, %v609_v10  ;;  %v718_v36 = vmul.f32 %v1081_v62, %v609_v10  ;;  %v1088_v10 = vld [vmem:[%s2372_s0 + $0x90] sm:$0xff] }
 0x15f   :  { %v1986_v11 = vpop.permute.xlu1 %613 }
 0x162   :  { %v1988_v37 = vpop.permute.xlu0 %638 }
 0x163   :  { %v619_v19 = vpop.permute.xlu1 %618  ;;  %v729_v17 = vmul.f32 %v1088_v10, %v1988_v37 }
 0x164   :  { %v721_v20 = vmul.f32 %v1082_v55, %v619_v19  ;;  %v722_v35 = vmul.f32 %v1083_v63, %v619_v19  ;;  %v1089_v19 = vld [vmem:[%s2372_s0 + $0x98] sm:$0xff]  ;;  %v1094_v63 = vld [vmem:[%s2372_s0 + $0x40] sm:$0xff] }
 0x166   :  { %v1990_v25 = vpop.permute.xlu0 %648 }
 0x167   :  { %v1992_v16 = vpop.permute.xlu1 %623 }
 0x16a   :  { %v1994_v13 = vpop.permute.xlu0 %658 }
 0x16b   :  { %v629_v1 = vpop.permute.xlu1 %628 }
 0x16c   :  { %v725_v28 = vmul.f32 %v1084_v38, %v629_v1  ;;  %v726_v54 = vmul.f32 %v1085_v50, %v629_v1  ;;  %v730_v1 = vmul.f32 %v1089_v19, %v1988_v37 }
 0x16e   :  { %v1996_v21 = vpop.permute.xlu0 %668 }
 0x16f   :  { %v1998_v34 = vpop.permute.xlu1 %633 }
 0x172   :  { %v2000_v41 = vpop.permute.xlu0 %678 }
 0x173   :  { %v2002_v30 = vpop.permute.xlu1 %643 }
 0x176   :  { %v2004_v61 = vpop.permute.xlu0 %688 }
 0x177   :  { %v2006_v53 = vpop.permute.xlu1 %653 }
 0x17a   :  { %v2008_v59 = vpop.permute.xlu0 %698 }
 0x17b   :  { %v2010_v39 = vpop.permute.xlu1 %663 }
 0x17e   :  { %v2012_v46 = vpop.permute.xlu0 %708 }
 0x17f   :  { %v2014_v4 = vpop.permute.xlu1 %673 }
 0x182   :  { %v767_v58 = vpop.permute.xlu0 %766 }
 0x183   :  { %v2022_v14 = vpop.permute.xlu1 %683  ;;  %v881_v18 = vadd.f32 %v767_v58, %v713_v12  ;;  %v882_v32 = vadd.f32 %v767_v58, %v714_v6  ;;  %v715_v6 = vmul.f32 %v1090_v29, %v1984_v26  ;;  %v1091_v58 = vld [vmem:[%s2372_s0 + $0x28] sm:$0xff] }
 0x185   :  { %v929_v47 = vmax.f32 %v881_v18, 0.0  ;;  %v930_v57 = vmax.f32 %v882_v32, 0.0  ;;  %v716_v18 = vmul.f32 %v1091_v58, %v1984_v26 }
 0x186   :  { %v777_v2 = vpop.permute.xlu0 %776 }
 0x187   :  { %977 = vst [vmem:[%s2375_s3 + $0x10] sm:$0xff] %v929_v47  ;;  %978 = vst.msk [vmem:[%s2375_s3 + $0x18] sm:$0xff] %vm62_vm0, %v930_v57  ;;  %v2037_v8 = vpop.permute.xlu1 %693  ;;  %v885_v3 = vadd.f32 %v777_v2, %v717_v48  ;;  %v886_v0 = vadd.f32 %v777_v2, %v718_v36  ;;  %v1092_v57 = vld [vmem:[%s2372_s0 + $0xb0] sm:$0xff] }
 0x188   :  { %v733_v2 = vmul.f32 %v1092_v57, %v1990_v25 }
 0x189   :  { %v933_v52 = vmax.f32 %v885_v3, 0.0  ;;  %v934_v40 = vmax.f32 %v886_v0, 0.0  ;;  %v1093_v3 = vld [vmem:[%s2372_s0 + $0xb8] sm:$0xff] }
 0x18a   :  { %v787_v42 = vpop.permute.xlu0 %786  ;;  %v734_v0 = vmul.f32 %v1093_v3, %v1990_v25 }
 0x18b   :  { %981 = vst [vmem:[%s2375_s3 + $0x30] sm:$0xff] %v933_v52  ;;  %982 = vst.msk [vmem:[%s2375_s3 + $0x38] sm:$0xff] %vm62_vm0, %v934_v40  ;;  %v2052_v22 = vpop.permute.xlu1 %703  ;;  %v889_v44 = vadd.f32 %v787_v42, %v721_v20  ;;  %v890_v33 = vadd.f32 %v787_v42, %v722_v35  ;;  %v719_v35 = vmul.f32 %v1094_v63, %v1986_v11  ;;  %v1095_v52 = vld [vmem:[%s2372_s0 + $0x48] sm:$0xff] }
 0x18c   :  { %v720_v40 = vmul.f32 %v1095_v52, %v1986_v11 }
 0x18d   :  { %v937_v43 = vmax.f32 %v889_v44, 0.0  ;;  %v938_v24 = vmax.f32 %v890_v33, 0.0 }
 0x18e   :  { %v797_v51 = vpop.permute.xlu0 %796 }
 0x18f   :  { %985 = vst [vmem:[%s2375_s3 + $0x50] sm:$0xff] %v937_v43  ;;  %986 = vst.msk [vmem:[%s2375_s3 + $0x58] sm:$0xff] %vm62_vm0, %v938_v24  ;;  %v762_v60 = vpop.permute.xlu1 %761  ;;  %v893_v7 = vadd.f32 %v797_v51, %v725_v28  ;;  %v894_v15 = vadd.f32 %v797_v51, %v726_v54  ;;  %v1096_v54 = vld [vmem:[%s2372_s0 + $0xd0] sm:$0xff]  ;;  %v1097_v24 = vld [vmem:[%s2372_s0 + $0xd8] sm:$0xff] }
 0x190   :  { %v879_v45 = vadd.f32 %v762_v60, %v711_v9  ;;  %v880_v23 = vadd.f32 %v762_v60, %v712_v56  ;;  %v737_v43 = vmul.f32 %v1096_v54, %v1994_v13  ;;  %v738_v27 = vmul.f32 %v1097_v24, %v1994_v13  ;;  %v1098_v56 = vld [vmem:[%s2372_s0 + $0x60] sm:$0xff]  ;;  %v1099_v60 = vld [vmem:[%s2372_s0 + $0x68] sm:$0xff] }
 0x191   :  { %v941_v31 = vmax.f32 %v893_v7, 0.0  ;;  %v942_v12 = vmax.f32 %v894_v15, 0.0  ;;  %v723_v51 = vmul.f32 %v1098_v56, %v1992_v16  ;;  %v724_v7 = vmul.f32 %v1099_v60, %v1992_v16 }
 0x192   :  { %v927_v32 = vmax.f32 %v879_v45, 0.0  ;;  %v928_v5 = vmax.f32 %v880_v23, 0.0  ;;  %v807_v48 = vpop.permute.xlu0 %806 }
 0x193   :  { %989 = vst [vmem:[%s2375_s3 + $0x70] sm:$0xff] %v941_v31  ;;  %990 = vst.msk [vmem:[%s2375_s3 + $0x78] sm:$0xff] %vm62_vm0, %v942_v12  ;;  %v772_v37 = vpop.permute.xlu1 %771  ;;  %v897_v62 = vadd.f32 %v807_v48, %v729_v17  ;;  %v898_v36 = vadd.f32 %v807_v48, %v730_v1  ;;  %v1100_v1 = vld [vmem:[%s2372_s0 + $0xf0] sm:$0xff]  ;;  %v1101_v12 = vld [vmem:[%s2372_s0 + $0xf8] sm:$0xff] }
 0x194   :  { %975 = vst [vmem:[%s2375_s3] sm:$0xff] %v927_v32  ;;  %976 = vst.msk [vmem:[%s2375_s3 + $0x8] sm:$0xff] %vm62_vm0, %v928_v5  ;;  %v883_v26 = vadd.f32 %v772_v37, %v715_v6  ;;  %v884_v47 = vadd.f32 %v772_v37, %v716_v18  ;;  %v741_v31 = vmul.f32 %v1100_v1, %v1996_v21  ;;  %v1102_v18 = vld [vmem:[%s2372_s0 + $0x80] sm:$0xff]  ;;  %v1103_v5 = vld [vmem:[%s2372_s0 + $0x88] sm:$0xff] }
 0x195   :  { %v945_v55 = vmax.f32 %v897_v62, 0.0  ;;  %v946_v20 = vmax.f32 %v898_v36, 0.0  ;;  %v742_v29 = vmul.f32 %v1101_v12, %v1996_v21  ;;  %v727_v32 = vmul.f32 %v1102_v18, %v1998_v34 }
 0x196   :  { %v931_v42 = vmax.f32 %v883_v26, 0.0  ;;  %v932_v44 = vmax.f32 %v884_v47, 0.0  ;;  %v817_v33 = vpop.permute.xlu0 %816  ;;  %v728_v48 = vmul.f32 %v1103_v5, %v1998_v34 }
 0x197   :  { %993 = vst [vmem:[%s2375_s3 + $0x90] sm:$0xff] %v945_v55  ;;  %994 = vst.msk [vmem:[%s2375_s3 + $0x98] sm:$0xff] %vm62_vm0, %v946_v20  ;;  %v782_v25 = vpop.permute.xlu1 %781  ;;  %v901_v38 = vadd.f32 %v817_v33, %v733_v2  ;;  %v902_v28 = vadd.f32 %v817_v33, %v734_v0  ;;  %v1104_v2 = vld [vmem:[%s2372_s0 + $0x110] sm:$0xff]  ;;  %v1105_v0 = vld [vmem:[%s2372_s0 + $0x118] sm:$0xff] }
 0x198   :  { %979 = vst [vmem:[%s2375_s3 + $0x20] sm:$0xff] %v931_v42  ;;  %980 = vst.msk [vmem:[%s2375_s3 + $0x28] sm:$0xff] %vm62_vm0, %v932_v44  ;;  %v887_v11 = vadd.f32 %v782_v25, %v719_v35  ;;  %v888_v50 = vadd.f32 %v782_v25, %v720_v40  ;;  %v745_v3 = vmul.f32 %v1104_v2, %v2000_v41  ;;  %v1106_v35 = vld [vmem:[%s2372_s0 + $0xa0] sm:$0xff]  ;;  %v1107_v40 = vld [vmem:[%s2372_s0 + $0xa8] sm:$0xff] }
 0x199   :  { %v949_v9 = vmax.f32 %v901_v38, 0.0  ;;  %v950_v49 = vmax.f32 %v902_v28, 0.0  ;;  %v746_v55 = vmul.f32 %v1105_v0, %v2000_v41  ;;  %v731_v52 = vmul.f32 %v1106_v35, %v2002_v30 }
 0x19a   :  { %v935_v15 = vmax.f32 %v887_v11, 0.0  ;;  %v936_v45 = vmax.f32 %v888_v50, 0.0  ;;  %v827_v23 = vpop.permute.xlu0 %826  ;;  %v732_v42 = vmul.f32 %v1107_v40, %v2002_v30  ;;  %v1108_v50 = vld [vmem:[%s2372_s0 + $0x130] sm:$0xff] }
 0x19b   :  { %997 = vst [vmem:[%s2375_s3 + $0xb0] sm:$0xff] %v949_v9  ;;  %998 = vst.msk [vmem:[%s2375_s3 + $0xb8] sm:$0xff] %vm62_vm0, %v950_v49  ;;  %v792_v13 = vpop.permute.xlu1 %791  ;;  %v905_v10 = vadd.f32 %v827_v23, %v737_v43  ;;  %v906_v17 = vadd.f32 %v827_v23, %v738_v27  ;;  %v749_v54 = vmul.f32 %v1108_v50, %v2004_v61  ;;  %v1109_v43 = vld [vmem:[%s2372_s0 + $0x138] sm:$0xff]  ;;  %v1110_v49 = vld [vmem:[%s2372_s0 + $0xc0] sm:$0xff] }
 0x19c   :  { %983 = vst [vmem:[%s2375_s3 + $0x40] sm:$0xff] %v935_v15  ;;  %984 = vst.msk [vmem:[%s2375_s3 + $0x48] sm:$0xff] %vm62_vm0, %v936_v45  ;;  %v891_v16 = vadd.f32 %v792_v13, %v723_v51  ;;  %v892_v19 = vadd.f32 %v792_v13, %v724_v7  ;;  %v750_v24 = vmul.f32 %v1109_v43, %v2004_v61  ;;  %v1111_v51 = vld [vmem:[%s2372_s0 + $0xc8] sm:$0xff] }
 0x19d   :  { %v953_v6 = vmax.f32 %v905_v10, 0.0  ;;  %v954_v58 = vmax.f32 %v906_v17, 0.0  ;;  %v735_v56 = vmul.f32 %v1110_v49, %v2006_v53  ;;  %v736_v60 = vmul.f32 %v1111_v51, %v2006_v53  ;;  %v1112_v17 = vld [vmem:[%s2372_s0 + $0x150] sm:$0xff] }
 0x19e   :  { %v939_v37 = vmax.f32 %v891_v16, 0.0  ;;  %v940_v62 = vmax.f32 %v892_v19, 0.0  ;;  %v837_v36 = vpop.permute.xlu0 %836  ;;  %v753_v16 = vmul.f32 %v1112_v17, %v2008_v59  ;;  %v1113_v19 = vld [vmem:[%s2372_s0 + $0x158] sm:$0xff] }
 0x19f   :  { %1001 = vst [vmem:[%s2375_s3 + $0xd0] sm:$0xff] %v953_v6  ;;  %1002 = vst.msk [vmem:[%s2375_s3 + $0xd8] sm:$0xff] %vm62_vm0, %v954_v58  ;;  %v802_v21 = vpop.permute.xlu1 %801  ;;  %v909_v26 = vadd.f32 %v837_v36, %v741_v31  ;;  %v910_v47 = vadd.f32 %v837_v36, %v742_v29  ;;  %v754_v1 = vmul.f32 %v1113_v19, %v2008_v59  ;;  %v1114_v29 = vld [vmem:[%s2372_s0 + $0xe0] sm:$0xff]  ;;  %v1115_v58 = vld [vmem:[%s2372_s0 + $0xe8] sm:$0xff] }
 0x1a0   :  { %987 = vst [vmem:[%s2375_s3 + $0x60] sm:$0xff] %v939_v37  ;;  %988 = vst.msk [vmem:[%s2375_s3 + $0x68] sm:$0xff] %vm62_vm0, %v940_v62  ;;  %v895_v34 = vadd.f32 %v802_v21, %v727_v32  ;;  %v896_v57 = vadd.f32 %v802_v21, %v728_v48  ;;  %v739_v6 = vmul.f32 %v1114_v29, %v2010_v39  ;;  %v1116_v21 = vld [vmem:[%s2372_s0 + $0x170] sm:$0xff] }
 0x1a1   :  { %v957_v20 = vmax.f32 %v909_v26, 0.0  ;;  %v958_v63 = vmax.f32 %v910_v47, 0.0  ;;  %v740_v18 = vmul.f32 %v1115_v58, %v2010_v39  ;;  %v757_v26 = vmul.f32 %v1116_v21, %v2012_v46  ;;  %v1117_v47 = vld [vmem:[%s2372_s0 + $0x178] sm:$0xff] }
 0x1a2   :  { %v943_v44 = vmax.f32 %v895_v34, 0.0  ;;  %v944_v33 = vmax.f32 %v896_v57, 0.0  ;;  %v847_v25 = vpop.permute.xlu0 %846  ;;  %v758_v34 = vmul.f32 %v1117_v47, %v2012_v46 }
 0x1a3   :  { %1005 = vst [vmem:[%s2375_s3 + $0xf0] sm:$0xff] %v957_v20  ;;  %1006 = vst.msk [vmem:[%s2375_s3 + $0xf8] sm:$0xff] %vm62_vm0, %v958_v63  ;;  %v812_v41 = vpop.permute.xlu1 %811  ;;  %v913_v38 = vadd.f32 %v847_v25, %v745_v3  ;;  %v914_v28 = vadd.f32 %v847_v25, %v746_v55  ;;  %v1118_v3 = vld [vmem:[%s2372_s0 + $0x100] sm:$0xff]  ;;  %v1119_v55 = vld [vmem:[%s2372_s0 + $0x108] sm:$0xff] }
 0x1a4   :  { %991 = vst [vmem:[%s2375_s3 + $0x80] sm:$0xff] %v943_v44  ;;  %992 = vst.msk [vmem:[%s2375_s3 + $0x88] sm:$0xff] %vm62_vm0, %v944_v33  ;;  %v899_v30 = vadd.f32 %v812_v41, %v731_v52  ;;  %v900_v11 = vadd.f32 %v812_v41, %v732_v42  ;;  %v743_v0 = vmul.f32 %v1118_v3, %v2014_v4  ;;  %v1120_v41 = vld [vmem:[%s2372_s0 + $0x120] sm:$0xff] }
 0x1a5   :  { %v961_v27 = vmax.f32 %v913_v38, 0.0  ;;  %v962_v9 = vmax.f32 %v914_v28, 0.0  ;;  %v744_v20 = vmul.f32 %v1119_v55, %v2014_v4  ;;  %v747_v38 = vmul.f32 %v1120_v41, %v2022_v14  ;;  %v1121_v28 = vld [vmem:[%s2372_s0 + $0x128] sm:$0xff] }
 0x1a6   :  { %v947_v7 = vmax.f32 %v899_v30, 0.0  ;;  %v948_v15 = vmax.f32 %v900_v11, 0.0  ;;  %v857_v45 = vpop.permute.xlu0 %856  ;;  %v748_v30 = vmul.f32 %v1121_v28, %v2022_v14 }
 0x1a7   :  { %1009 = vst [vmem:[%s2375_s3 + $0x110] sm:$0xff] %v961_v27  ;;  %1010 = vst.msk [vmem:[%s2375_s3 + $0x118] sm:$0xff] %vm62_vm0, %v962_v9  ;;  %v822_v61 = vpop.permute.xlu1 %821  ;;  %v917_v23 = vadd.f32 %v857_v45, %v749_v54  ;;  %v918_v13 = vadd.f32 %v857_v45, %v750_v24  ;;  %v1122_v24 = vld [vmem:[%s2372_s0 + $0x140] sm:$0xff]  ;;  %v1123_v9 = vld [vmem:[%s2372_s0 + $0x148] sm:$0xff] }
 0x1a8   :  { %995 = vst [vmem:[%s2375_s3 + $0xa0] sm:$0xff] %v947_v7  ;;  %996 = vst.msk [vmem:[%s2375_s3 + $0xa8] sm:$0xff] %vm62_vm0, %v948_v15  ;;  %v903_v53 = vadd.f32 %v822_v61, %v735_v56  ;;  %v904_v10 = vadd.f32 %v822_v61, %v736_v60  ;;  %v751_v27 = vmul.f32 %v1122_v24, %v2037_v8  ;;  %v1124_v45 = vld [vmem:[%s2372_s0 + $0x160] sm:$0xff]  ;;  %v1125_v61 = vld [vmem:[%s2372_s0 + $0x168] sm:$0xff] }
 0x1a9   :  { %v965_v31 = vmax.f32 %v917_v23, 0.0  ;;  %v966_v12 = vmax.f32 %v918_v13, 0.0  ;;  %v752_v49 = vmul.f32 %v1123_v9, %v2037_v8  ;;  %v755_v8 = vmul.f32 %v1124_v45, %v2052_v22 }
 0x1aa   :  { %v951_v32 = vmax.f32 %v903_v53, 0.0  ;;  %v952_v5 = vmax.f32 %v904_v10, 0.0  ;;  %v867_v48 = vpop.permute.xlu0 %866  ;;  %v756_v23 = vmul.f32 %v1125_v61, %v2052_v22 }
 0x1ab   :  { %1013 = vst [vmem:[%s2375_s3 + $0x130] sm:$0xff] %v965_v31  ;;  %1014 = vst.msk [vmem:[%s2375_s3 + $0x138] sm:$0xff] %vm62_vm0, %v966_v12  ;;  %v832_v59 = vpop.permute.xlu1 %831  ;;  %v921_v37 = vadd.f32 %v867_v48, %v753_v16  ;;  %v922_v62 = vadd.f32 %v867_v48, %v754_v1 }
 0x1ac   :  { %999 = vst [vmem:[%s2375_s3 + $0xc0] sm:$0xff] %v951_v32  ;;  %1000 = vst.msk [vmem:[%s2375_s3 + $0xc8] sm:$0xff] %vm62_vm0, %v952_v5  ;;  %v907_v39 = vadd.f32 %v832_v59, %v739_v6  ;;  %v908_v36 = vadd.f32 %v832_v59, %v740_v18 }
 0x1ad   :  { %v969_v57 = vmax.f32 %v921_v37, 0.0  ;;  %v970_v2 = vmax.f32 %v922_v62, 0.0 }
 0x1ae   :  { %v955_v63 = vmax.f32 %v907_v39, 0.0  ;;  %v956_v35 = vmax.f32 %v908_v36, 0.0  ;;  %v877_v52 = vpop.permute.xlu0 %876 }
 0x1af   :  { %1017 = vst [vmem:[%s2375_s3 + $0x150] sm:$0xff] %v969_v57  ;;  %1018 = vst.msk [vmem:[%s2375_s3 + $0x158] sm:$0xff] %vm62_vm0, %v970_v2  ;;  %v842_v46 = vpop.permute.xlu1 %841  ;;  %v925_v40 = vadd.f32 %v877_v52, %v757_v26  ;;  %v926_v42 = vadd.f32 %v877_v52, %v758_v34 }
 0x1b0   :  { %1003 = vst [vmem:[%s2375_s3 + $0xe0] sm:$0xff] %v955_v63  ;;  %1004 = vst.msk [vmem:[%s2375_s3 + $0xe8] sm:$0xff] %vm62_vm0, %v956_v35  ;;  %v911_v4 = vadd.f32 %v842_v46, %v743_v0  ;;  %v912_v44 = vadd.f32 %v842_v46, %v744_v20 }
 0x1b1   :  { %v973_v33 = vmax.f32 %v925_v40, 0.0  ;;  %v974_v25 = vmax.f32 %v926_v42, 0.0 }
 0x1b2   :  { %v959_v11 = vmax.f32 %v911_v4, 0.0  ;;  %v960_v50 = vmax.f32 %v912_v44, 0.0 }
 0x1b3   :  { %1021 = vst [vmem:[%s2375_s3 + $0x170] sm:$0xff] %v973_v33  ;;  %1022 = vst.msk [vmem:[%s2375_s3 + $0x178] sm:$0xff] %vm62_vm0, %v974_v25  ;;  %v852_v54 = vpop.permute.xlu1 %851 }
 0x1b4   :  { %1007 = vst [vmem:[%s2375_s3 + $0x100] sm:$0xff] %v959_v11  ;;  %1008 = vst.msk [vmem:[%s2375_s3 + $0x108] sm:$0xff] %vm62_vm0, %v960_v50  ;;  %v915_v14 = vadd.f32 %v852_v54, %v747_v38  ;;  %v916_v43 = vadd.f32 %v852_v54, %v748_v30 }
 0x1b6   :  { %v963_v56 = vmax.f32 %v915_v14, 0.0  ;;  %v964_v51 = vmax.f32 %v916_v43, 0.0 }
 0x1b7   :  { %v862_v60 = vpop.permute.xlu1 %861 }
 0x1b8   :  { %1011 = vst [vmem:[%s2375_s3 + $0x120] sm:$0xff] %v963_v56  ;;  %1012 = vst.msk [vmem:[%s2375_s3 + $0x128] sm:$0xff] %vm62_vm0, %v964_v51  ;;  %v919_v7 = vadd.f32 %v862_v60, %v751_v27  ;;  %v920_v15 = vadd.f32 %v862_v60, %v752_v49 }
 0x1ba   :  { %v967_v13 = vmax.f32 %v919_v7, 0.0  ;;  %v968_v53 = vmax.f32 %v920_v15, 0.0 }
 0x1bb   :  { %v872_v10 = vpop.permute.xlu1 %871 }
 0x1bc   :  { %1015 = vst [vmem:[%s2375_s3 + $0x140] sm:$0xff] %v967_v13  ;;  %1016 = vst.msk [vmem:[%s2375_s3 + $0x148] sm:$0xff] %vm62_vm0, %v968_v53  ;;  %v923_v17 = vadd.f32 %v872_v10, %v755_v8  ;;  %v924_v16 = vadd.f32 %v872_v10, %v756_v23 }
 0x1be   :  { %v971_v19 = vmax.f32 %v923_v17, 0.0  ;;  %v972_v1 = vmax.f32 %v924_v16, 0.0 }
 0x1c0   :  { %1019 = vst [vmem:[%s2375_s3 + $0x160] sm:$0xff] %v971_v19  ;;  %1020 = vst.msk [vmem:[%s2375_s3 + $0x168] sm:$0xff] %vm62_vm0, %v972_v1 }

</bundles_post_ra>
